<compile_context>
chip_gen: v5e
topology: v5e:2x2
jax: 0.10.0
libtpu: 0.0.40
codegen_flags: <defaults>
</compile_context>

<pallas_src>
import jax
import jax.numpy as jnp
from jax.experimental import pallas as pl
from jax.experimental.pallas import tpu as pltpu


def linear_relu_kernel(x_ref, wt_ref, o_ref):
    # x_ref: [TB, K]   wt_ref: [K, N] (pre-transposed once in the wrapper)
    acc = jnp.dot(x_ref[...], wt_ref[...], preferred_element_type=jnp.float32)
    o_ref[...] = jnp.maximum(acc, 0.0).astype(o_ref.dtype)


def _cost(B, K, N, in_itemsize, out_itemsize):
    return pl.CostEstimate(
        flops=2 * B * K * N,
        transcendentals=0,
        bytes_accessed=(B * K + K * N) * in_itemsize + B * N * out_itemsize,
    )


def single_layer_network(x, weight, *, batch_tile=4096, out_dtype=None):
    """x: [B, n_input]; weight: [n_output, n_input] (PyTorch Linear layout)."""
    B, K = x.shape
    N, Kw = weight.shape
    assert K == Kw, "weight must be [n_output, n_input]"
    out_dtype = x.dtype if out_dtype is None else out_dtype
    cost = _cost(B, K, N,
                 jnp.dtype(x.dtype).itemsize, jnp.dtype(out_dtype).itemsize)

    # One-time 64 KiB transpose -> [K, N]; keeps the weight lane-dense in the
    # kernel and avoids a per-grid-step XLU transpose from an NT contraction.
    w_t = weight.T

    if B > batch_tile:
        # Batch-tiled path. Ragged last tile handled by pl.cdiv + masked
        # boundary stores (rows are independent, so this is exact).
        TB = batch_tile
        return pl.pallas_call(
            linear_relu_kernel,
            out_shape=jax.ShapeDtypeStruct((B, N), out_dtype),
            grid=(pl.cdiv(B, TB),),
            in_specs=[
                pl.BlockSpec((TB, K), lambda i: (i, 0)),
                pl.BlockSpec((K, N), lambda i: (0, 0)),   # resident, not re-DMA'd
            ],
            out_specs=pl.BlockSpec((TB, N), lambda i: (i, 0)),
            compiler_params=pltpu.CompilerParams(
                dimension_semantics=("parallel",),
            ),
            cost_estimate=cost,
        )(x, w_t)

    # Genuinely small problem (B <= batch_tile, <= ~5 MiB of VMEM at the
    # default tile): single invocation, whole arrays in VMEM, no pipeline.
    return pl.pallas_call(
        linear_relu_kernel,
        out_shape=jax.ShapeDtypeStruct((B, N), out_dtype),
        in_specs=[
            pl.BlockSpec(memory_space=pltpu.MemorySpace.VMEM),
            pl.BlockSpec(memory_space=pltpu.MemorySpace.VMEM),
        ],
        out_specs=pl.BlockSpec(memory_space=pltpu.MemorySpace.VMEM),
        cost_estimate=cost,
    )(x, w_t)


if __name__ == "__main__":
    n_input = 64
    n_output = 256
    batch = 8

    key = jax.random.PRNGKey(0)
    kx, kw, kx2 = jax.random.split(key, 3)
    x = jax.random.normal(kx, (batch, n_input), dtype=jnp.float32)
    # Deterministic init mimicking nn.Linear default (uniform in +/- 1/sqrt(fan_in))
    bound = 1.0 / (n_input ** 0.5)
    weight = jax.random.uniform(
        kw, (n_output, n_input), dtype=jnp.float32, minval=-bound, maxval=bound
    )

    # Small path (no grid), matches the PyTorch module at batch=8.
    out = single_layer_network(x, weight)
    jax.block_until_ready(out)
    ref = jnp.maximum(x @ weight.T, 0.0)
    assert out.shape == (batch, n_output)
    assert jnp.allclose(out, ref, atol=1e-5, rtol=1e-5)

    # Exercise the batch-tiled + ragged-B path with a small tile override.
    x2 = jax.random.normal(kx2, (300, n_input), dtype=jnp.float32)
    out2 = single_layer_network(x2, weight, batch_tile=128)
    jax.block_until_ready(out2)
    ref2 = jnp.maximum(x2 @ weight.T, 0.0)
    assert out2.shape == (300, n_output)
    assert jnp.allclose(out2, ref2, atol=1e-5, rtol=1e-5)

    print("KERNEL_OK")
</pallas_src>

<mosaic_0001>
module attributes {stable_mosaic.version = 11 : i64} {
  func.func @linear_relu_kernel(%arg0: memref<8x64xf32, #tpu.memory_space<vmem>>, %arg1: memref<64x256xf32, #tpu.memory_space<vmem>>, %arg2: memref<8x256xf32, #tpu.memory_space<vmem>>) attributes {dimension_semantics = [], scalar_prefetch = 0 : i64, scratch_operands = 0 : i64, tpu.core_type = #tpu.core_type<tc>} {
    %c0 = arith.constant 0 : index
    %c0_0 = arith.constant 0 : index
    %0 = vector.load %arg0[%c0, %c0_0] : memref<8x64xf32, #tpu.memory_space<vmem>>, vector<8x64xf32>
    %c0_1 = arith.constant 0 : index
    %c0_2 = arith.constant 0 : index
    %1 = vector.load %arg1[%c0_1, %c0_2] : memref<64x256xf32, #tpu.memory_space<vmem>>, vector<64x256xf32>
    %cst = arith.constant dense<0.000000e+00> : vector<8x256xf32>
    %2 = tpu.matmul %0, %1, %cst {dimension_numbers = #tpu.dot_dimension_numbers<[1], [0], [0], [1], [0, 0, 1, 1], [], []>} : vector<8x64xf32>, vector<64x256xf32>, vector<8x256xf32> -> vector<8x256xf32>
    %cst_3 = arith.constant 0.000000e+00 : f32
    %3 = vector.broadcast %cst_3 : f32 to vector<8x256xf32>
    %4 = arith.maximumf %2, %3 : vector<8x256xf32>
    %c0_4 = arith.constant 0 : index
    %c0_5 = arith.constant 0 : index
    %5 = vector.load %arg2[%c0_4, %c0_5] : memref<8x256xf32, #tpu.memory_space<vmem>>, vector<8x256xf32>
    tpu.vector_store %arg2[%c0_4, %c0_5], %4 {strides = array<i32>} : memref<8x256xf32, #tpu.memory_space<vmem>>, vector<8x256xf32>,
    return
  }
}

</mosaic_0001>

<bundles_post_ra>
// kernel: tpu_custom_call.1
= control target key start
LH: loop header
LB: loop body
LE: loop exit
PB: predicated region body
PF: predicated region fallthrough
CT: control target
= control target key end

     0   :  { %7 = vsyncpa [#allocation3], 0  ;;  %s239_s0 = inlined_call_operand.hbm [shape: f32[8,64], index: 0, kind: input, shape index: {}]   ;;  %s240_s1 = inlined_call_operand.hbm [shape: f32[64,256], index: 1, kind: input, shape index: {}]   ;;  %s241_s2 = inlined_call_operand.hbm [shape: f32[8,256], index: 2, kind: output, shape index: {}]  }
   0x1   :  { %8 = vsyncpa [#allocation6], 0 }
   0x2   :  { %9 = vsyncpa [#allocation4], 0  ;;  %s15_s11 = sshll.u32 %s239_s0, 4  ;;  %s210_s12 = smov [#allocation2]   ;;  %s16_s11 = int_to_ptr.hbm [resolvable:$true] %s15_s11 }
   0x3   :  { %s17_s13 = sshll.u32 %s210_s12, 4  ;;  %s25_s16 = sshll.u32 %s240_s1, 4  ;;  %s18_s13 = int_to_ptr.vmem [resolvable:$true] %s17_s13  ;;  %s26_s16 = int_to_ptr.hbm [resolvable:$true] %s25_s16 }
   0x4   :  { %20 = dma.hbm_to_vmem [thread:$0]  %s16_s11, 128, %s18_s13, [#allocation3]  }
   0x5   :  { %s211_s17 = smov [#allocation5]   ;;  %s212_s19 = smov 256  }
   0x6   :  { %s27_s18 = sshll.u32 %s211_s17, 4  ;;  %s213_s20 = smov 16   ;;  %s28_s18 = int_to_ptr.vmem [resolvable:$true] %s27_s18 }
   0x7   :  { %33 = dma.hbm_to_vmem [thread:$0]  %s26_s16, 2048, %s28_s18, [#allocation6], %s212_s19, %s212_s19, %s213_s20  }
   0x8   :  { %204 = dma.done.wait [#allocation3], 128  }
   0x9   :  { %205 = vsyncadd [#allocation3], 4294967168 }
   0xa   :  { %206 = dma.done.wait [#allocation6], 2048  }
   0xb   :  { %207 = vsyncadd [#allocation6], 4294965248  ;;  %v57_v0 = vld [vmem:[#allocation5 + $0x70] sm:$0xff]  ;;  %v58_v1 = vld [vmem:[#allocation5 + $0x78] sm:$0xff]  ;;  %vm59_vm0 = vcmask 523264   ;;  %s214_s0 = smov [#allocation7]  }
   0xc   :  { %v55_v2 = vld [vmem:[#allocation5 + $0x60] sm:$0xff]  ;;  %71 = vmatpush.msra.mxu0 %v57_v0  ;;  %91 = vmatpush.msra.mxu1 %v58_v1  ;;  %v56_v3 = vld [vmem:[#allocation5 + $0x68] sm:$0xff]  ;;  %v53_v4 = vld [vmem:[#allocation5 + $0x50] sm:$0xff]  ;;  %s112_s1 = sshll.u32 %s214_s0, 4  ;;  %s114_s23 = sshll.u32 %s241_s2, 4  ;;  %s113_s1 = int_to_ptr.vmem [resolvable:$true] %s112_s1  ;;  %s115_s23 = int_to_ptr.hbm [resolvable:$true] %s114_s23 }
   0xd   :  { %v54_v5 = vld [vmem:[#allocation5 + $0x58] sm:$0xff]  ;;  %v51_v6 = vld [vmem:[#allocation5 + $0x40] sm:$0xff]  ;;  %v52_v7 = vld [vmem:[#allocation5 + $0x48] sm:$0xff] }
   0xe   :  { %72 = vmatpush.msra.mxu0 %v55_v2  ;;  %92 = vmatpush.msra.mxu1 %v56_v3  ;;  %v49_v8 = vld [vmem:[#allocation5 + $0x30] sm:$0xff]  ;;  %v50_v9 = vld [vmem:[#allocation5 + $0x38] sm:$0xff]  ;;  %v47_v10 = vld [vmem:[#allocation5 + $0x20] sm:$0xff] }
   0xf   :  { %v48_v11 = vld [vmem:[#allocation5 + $0x28] sm:$0xff]  ;;  %v45_v12 = vld [vmem:[#allocation5 + $0x10] sm:$0xff]  ;;  %v46_v13 = vld [vmem:[#allocation5 + $0x18] sm:$0xff] }
  0x10   :  { %73 = vmatpush.msra.mxu0 %v53_v4  ;;  %93 = vmatpush.msra.mxu1 %v54_v5  ;;  %v43_v14 = vld [vmem:[#allocation5] sm:$0xff]  ;;  %v44_v15 = vld [vmem:[#allocation5 + $0x8] sm:$0xff]  ;;  %v42_v16 = vld [vmem:[#allocation2] sm:$0xff] }
  0x12   :  { %74 = vmatpush.msra.mxu0 %v51_v6  ;;  %94 = vmatpush.msra.mxu1 %v52_v7 }
  0x14   :  { %75 = vmatpush.msra.mxu0 %v49_v8  ;;  %95 = vmatpush.msra.mxu1 %v50_v9 }
  0x16   :  { %76 = vmatpush.msra.mxu0 %v47_v10  ;;  %96 = vmatpush.msra.mxu1 %v48_v11 }
  0x18   :  { %77 = vmatpush.msra.mxu0 %v45_v12  ;;  %97 = vmatpush.msra.mxu1 %v46_v13 }
  0x1a   :  { %78 = vmatpush.msra.mxu0 %v43_v14  ;;  %98 = vmatpush.msra.mxu1 %v44_v15 }
  0x1b   :  { %125 = vmatmul.msk.f32.vlgmr.msra.gmra.mxu0 %vm59_vm0, %v42_v16  ;;  %126 = vmatmul.msk.f32.vlgmr.msra.gmra.mxu1 %vm59_vm0, %v42_v16 }
  0x98   :  { %v80_v17 = vpop.f32.mrf.mxu0  ;;  %v100_v18 = vpop.f32.mrf.mxu1 }
  0x99   :  { %v103_v19 = vmax.f32 %v80_v17, 0.0  ;;  %v104_v20 = vmax.f32 %v100_v18, 0.0 }
  0x9b   :  { %105 = vst [vmem:[#allocation7] sm:$0xff] %v103_v19 }
  0x9c   :  { %106 = vst [vmem:[#allocation7 + $0x8] sm:$0xff] %v104_v20 }
  0x9d   :  { %117 = dma.vmem_to_hbm [thread:$0]  %s113_s1, 256, %s115_s23, [#allocation4]  }
  0x9e   :  { %208 = dma.done.wait [#allocation4], 256  }
  0x9f   :  { %209 = vsyncadd [#allocation4], 4294967040 }
  0xa0   :  { %122 = vsyncpa [#allocation3], 1 }
  0xa1   :  { %123 = vsyncpa [#allocation6], 1 }
  0xa2   :  { %124 = vsyncpa [#allocation4], 1 }

</bundles_post_ra>
